<compile_context>
chip_gen: v6e
topology: v6e:2x2x1
jax: 0.10.0
libtpu: 0.0.40
codegen_flags: <defaults>
</compile_context>

<pallas_src>
import functools

import jax
import jax.numpy as jnp
from jax.experimental import pallas as pl
from jax.experimental.pallas import tpu as pltpu


def _round_up(x, m):
    return ((x + m - 1) // m) * m


def _spike_conv_kernel(x_ref, halo_ref, w_ref, b_ref, thr_ref, mem_ref,
                       spike_ref, mem_out_ref, win_ref, *, taps, bm):
    """One (Cout, bm) output tile: conv taps + bias/shift + membrane + spike."""
    bs = halo_ref.shape[-1]
    # Assemble the input window covering all kh*kw tap shifts (aligned stores).
    win_ref[:, :bm] = x_ref[...]
    win_ref[:, bm:bm + bs] = halo_ref[...]

    # Membrane + (bias + shift); conv taps accumulate on top in f32.
    acc = mem_ref[...] + b_ref[...]                          # (Cout, bm) f32
    for t, s in enumerate(taps):                             # static unroll (kh*kw)
        acc = acc + jnp.dot(w_ref[t], win_ref[:, pl.ds(s, bm)],
                            preferred_element_type=jnp.float32)

    thr = thr_ref[0]                                         # SMEM scalar
    spike = (acc - thr >= 0.0).astype(jnp.float32)           # SpikeAct.forward
    spike_ref[...] = spike.astype(spike_ref.dtype)           # bf16 {0,1}
    mem_out_ref[...] = acc - spike                           # soft reset


def spike_step_flat(x_flat, w_taps, b_fused, thr, mem_flat, *, taps, bm, bs):
    """One SNN timestep in the flat kernel layout.

    x_flat  : (Cin,  Min)          bf16  padded-image pixels, pixel axis on lanes
    w_taps  : (kh*kw, Cout, Cin)   bf16  per-tap weight slices
    b_fused : (Cout, 1)            f32   bias + threshold*0.5/sim_length
    thr     : (1,)                 f32   threshold
    mem_flat: (Cout, Mout)         f32   membrane state (flat padded-grid layout)
    Returns (spike_flat bf16 (Cout, Mout), new mem_flat f32 (Cout, Mout)).
    Multi-timestep callers should loop this directly, keeping mem_flat flat.
    """
    Cin, Min = x_flat.shape
    nt, Cout, _ = w_taps.shape
    _, Mout = mem_flat.shape
    grid_m = Mout // bm
    step = bm // bs
    K = nt * Cin

    cost = pl.CostEstimate(
        flops=2 * Mout * K * Cout,
        transcendentals=0,
        bytes_accessed=int(Min * Cin * 2 + grid_m * Cin * bs * 2
                           + K * Cout * 2 + Cout * 4
                           + Mout * Cout * (4 + 2 + 4)))

    kernel = functools.partial(_spike_conv_kernel, taps=taps, bm=bm)

    spike_flat, mem_new = pl.pallas_call(
        kernel,
        out_shape=(jax.ShapeDtypeStruct((Cout, Mout), jnp.bfloat16),   # spike
                   jax.ShapeDtypeStruct((Cout, Mout), jnp.float32)),   # new mem
        grid=(grid_m,),
        in_specs=[
            pl.BlockSpec((Cin, bm), lambda i: (0, i)),                 # input block
            pl.BlockSpec((Cin, bs), lambda i: (0, (i + 1) * step)),    # right halo
            pl.BlockSpec((nt, Cout, Cin), lambda i: (0, 0, 0)),        # weights (resident)
            pl.BlockSpec((Cout, 1), lambda i: (0, 0)),                 # bias+shift (resident)
            pl.BlockSpec(memory_space=pltpu.MemorySpace.SMEM),         # threshold scalar
            pl.BlockSpec((Cout, bm), lambda i: (0, i)),                # membrane in (f32)
        ],
        out_specs=(pl.BlockSpec((Cout, bm), lambda i: (0, i)),         # spike (bf16)
                   pl.BlockSpec((Cout, bm), lambda i: (0, i))),        # membrane out (f32)
        scratch_shapes=[pltpu.VMEM((Cin, bm + bs), jnp.bfloat16)],     # tap window
        input_output_aliases={5: 1},        # membrane state updated in place
        compiler_params=pltpu.CompilerParams(
            dimension_semantics=("parallel",),
            vmem_limit_bytes=32 * 1024 * 1024),
        cost_estimate=cost,
    )(x_flat, x_flat, w_taps, b_fused, thr, mem_flat)
    return spike_flat, mem_new


def spike_module_nq_forward(x, weight, bias, mem_pot, threshold, sim_length,
                            *, block_m=4096):
    """x: (N, Cin, H, W) NCHW.  weight: (Cout, Cin, kh, kw).  bias: (Cout,).
       mem_pot: (N, Cout, H, W).  Returns (spike, new_mem_pot), both NCHW f32."""
    N, Cin, H, W = x.shape
    Cout, _, kh, kw = weight.shape
    assert kh % 2 == 1 and kw % 2 == 1, "odd kernels only ('SAME', stride 1)"
    ph, pw = kh // 2, kw // 2
    Hp, Wp = H + 2 * ph, W + 2 * pw
    M2 = N * Hp * Wp

    # Tap geometry: output pixel q (padded grid, top-left-aligned) reads padded
    # input pixels q + dh*Wp + dw for (dh, dw) in the kernel window.
    taps = tuple(dh * Wp + dw for dh in range(kh) for dw in range(kw))
    s_max = taps[-1]
    bs = _round_up(max(s_max, 1), 128)                    # halo width (lanes)
    bm = min(block_m, _round_up(pl.cdiv(M2, 2), bs))      # keep >= 2 grid steps (v7x)
    bm = max(bs, _round_up(bm, bs))
    grid_m = pl.cdiv(M2, bm)
    Mout = grid_m * bm
    Min = Mout + bs

    # Host-side layout glue: everything transposed to (channels, pixels) so the
    # pixel axis sits on the 128-wide lane dimension.  No im2col duplication.
    xpad = jnp.pad(x, ((0, 0), (0, 0), (ph, ph), (pw, pw)))
    x_flat = xpad.transpose(1, 0, 2, 3).reshape(Cin, M2).astype(jnp.bfloat16)
    x_flat = jnp.pad(x_flat, ((0, 0), (0, Min - M2)))

    w_taps = weight.transpose(2, 3, 0, 1).reshape(kh * kw, Cout, Cin)
    w_taps = w_taps.astype(jnp.bfloat16)

    shift = jnp.asarray(threshold, jnp.float32) * (0.5 / float(sim_length))
    b_fused = bias.astype(jnp.float32).reshape(Cout, 1) + shift
    thr = jnp.asarray(threshold, jnp.float32).reshape(1)

    # Membrane state on the same padded pixel grid (valid region = top-left HxW
    # corner of each padded image; the pad region is garbage and never read back).
    memp = jnp.pad(mem_pot.astype(jnp.float32).transpose(1, 0, 2, 3),
                   ((0, 0), (0, 0), (0, 2 * ph), (0, 2 * pw)))
    mem_flat = jnp.pad(memp.reshape(Cout, M2), ((0, 0), (0, Mout - M2)))

    spike_flat, mem_new_flat = spike_step_flat(
        x_flat, w_taps, b_fused, thr, mem_flat, taps=taps, bm=bm, bs=bs)

    def unflatten(a):
        a = a[:, :M2].reshape(Cout, N, Hp, Wp)[:, :, :H, :W]
        return a.transpose(1, 0, 2, 3)

    spike = unflatten(spike_flat).astype(jnp.float32)
    mem_new = unflatten(mem_new_flat)
    return spike, mem_new


def _reference(x, weight, bias, mem_pot, threshold, sim_length):
    """Pure-JAX reference mirroring the PyTorch forward.  Conv operands are cast
    to bf16 (f32 accumulation) to match the kernel's MXU numerics."""
    y = jax.lax.conv_general_dilated(
        x.astype(jnp.bfloat16), weight.astype(jnp.bfloat16),
        window_strides=(1, 1), padding='SAME',
        dimension_numbers=('NCHW', 'OIHW', 'NCHW'),
        preferred_element_type=jnp.float32)
    y = y + bias.reshape(1, -1, 1, 1).astype(jnp.float32)
    y = y + jnp.asarray(threshold, jnp.float32) * (0.5 / float(sim_length))
    mem = mem_pot.astype(jnp.float32) + y
    spike = (mem - threshold >= 0.0).astype(jnp.float32)
    return spike, mem - spike, mem


if __name__ == "__main__":
    # Small, deterministic shapes consistent with the module (Conv2d variant).
    N, Cin, H, W = 2, 4, 16, 16
    Cout, kh, kw = 8, 3, 3
    sim_length = 8
    threshold = 1.0

    key = jax.random.PRNGKey(0)
    kx, kw_, kb, km = jax.random.split(key, 4)
    x = jax.random.normal(kx, (N, Cin, H, W), dtype=jnp.float32)
    weight = jax.random.normal(kw_, (Cout, Cin, kh, kw), dtype=jnp.float32) * 0.2
    bias = jax.random.normal(kb, (Cout,), dtype=jnp.float32) * 0.1
    mem_pot = jax.random.normal(km, (N, Cout, H, W), dtype=jnp.float32) * 0.3

    # At this demo size the block-size heuristic yields a 2-step grid, which
    # still exercises the pipeline and the halo-block indexing.
    spike, mem_new = spike_module_nq_forward(
        x, weight, bias, mem_pot, threshold, sim_length)
    jax.block_until_ready((spike, mem_new))

    ref_spike, ref_mem_new, ref_mem_pre = _reference(
        x, weight, bias, mem_pot, threshold, float(sim_length))

    # The spike nonlinearity is discontinuous at the threshold; with bf16
    # matmul operands, membrane values within ~1e-3 of the threshold may
    # legitimately flip relative to the reference, so compare away from it.
    safe = jnp.abs(ref_mem_pre - threshold) > 1e-3
    assert float(jnp.mean(safe)) > 0.9, "comparison mask degenerate"
    assert bool(jnp.all((spike == ref_spike) | ~safe)), "spike mismatch"
    assert bool(jnp.all((jnp.abs(mem_new - ref_mem_new) < 1e-3) | ~safe)), \
        "mem_pot mismatch"

    print("KERNEL_OK")
</pallas_src>

<mosaic_0001>
module attributes {stable_mosaic.version = 11 : i64} {
  func.func @_spike_conv_kernel(%arg0: i32, %arg1: memref<4x384xbf16, #tpu.memory_space<vmem>>, %arg2: memref<4x128xbf16, #tpu.memory_space<vmem>>, %arg3: memref<9x8x4xbf16, #tpu.memory_space<vmem>>, %arg4: memref<8x1xf32, #tpu.memory_space<vmem>>, %arg5: memref<1xf32, #tpu.memory_space<smem>>, %arg6: memref<8x384xf32, #tpu.memory_space<vmem>>, %arg7: memref<8x384xbf16, #tpu.memory_space<vmem>>, %arg8: memref<8x384xf32, #tpu.memory_space<vmem>>, %arg9: memref<4x512xbf16, #tpu.memory_space<vmem>>) attributes {dimension_semantics = [#tpu.dimension_semantics<parallel>], iteration_bounds = array<i64: 2>, scalar_prefetch = 0 : i64, scratch_operands = 1 : i64, tpu.core_type = #tpu.core_type<tc>, window_params = [{transform_indices = @transform_0, window_bounds = array<i64: 4, 384>}, {transform_indices = @transform_1, window_bounds = array<i64: 4, 128>}, {pipeline_mode = #tpu.pipeline_mode<synchronous>, transform_indices = @transform_2, window_bounds = array<i64: 9, 8, 4>}, {pipeline_mode = #tpu.pipeline_mode<synchronous>, transform_indices = @transform_3, window_bounds = array<i64: 8, 1>}, {transform_indices = @transform_4, window_bounds = array<i64: 1>}, {transform_indices = @transform_5, window_bounds = array<i64: 8, 384>}, {transform_indices = @transform_6, window_bounds = array<i64: 8, 384>}, {transform_indices = @transform_7, window_bounds = array<i64: 8, 384>}]} {
    %c0 = arith.constant 0 : index
    %c0_0 = arith.constant 0 : index
    %0 = vector.load %arg1[%c0, %c0_0] : memref<4x384xbf16, #tpu.memory_space<vmem>>, vector<4x384xbf16>
    %c0_1 = arith.constant 0 : index
    %c0_2 = arith.constant 0 : index
    %1 = vector.load %arg9[%c0_1, %c0_2] : memref<4x512xbf16, #tpu.memory_space<vmem>>, vector<4x384xbf16>
    tpu.vector_store %arg9[%c0_1, %c0_2], %0 {strides = array<i32>} : memref<4x512xbf16, #tpu.memory_space<vmem>>, vector<4x384xbf16>,
    %c0_3 = arith.constant 0 : index
    %c0_4 = arith.constant 0 : index
    %2 = vector.load %arg2[%c0_3, %c0_4] : memref<4x128xbf16, #tpu.memory_space<vmem>>, vector<4x128xbf16>
    %c0_5 = arith.constant 0 : index
    %c384 = arith.constant 384 : index
    %3 = vector.load %arg9[%c0_5, %c384] : memref<4x512xbf16, #tpu.memory_space<vmem>>, vector<4x128xbf16>
    tpu.vector_store %arg9[%c0_5, %c384], %2 {strides = array<i32>} : memref<4x512xbf16, #tpu.memory_space<vmem>>, vector<4x128xbf16>,
    %c0_6 = arith.constant 0 : index
    %c0_7 = arith.constant 0 : index
    %4 = vector.load %arg6[%c0_6, %c0_7] : memref<8x384xf32, #tpu.memory_space<vmem>>, vector<8x384xf32>
    %c0_8 = arith.constant 0 : index
    %c0_9 = arith.constant 0 : index
    %5 = vector.load %arg4[%c0_8, %c0_9] : memref<8x1xf32, #tpu.memory_space<vmem>>, vector<8x1xf32>
    %6 = vector.broadcast %5 : vector<8x1xf32> to vector<8x384xf32>
    %7 = arith.addf %4, %6 : vector<8x384xf32>
    %c0_10 = arith.constant 0 : index
    %c0_11 = arith.constant 0 : index
    %c0_12 = arith.constant 0 : index
    %8 = vector.load %arg3[%c0_10, %c0_11, %c0_12] : memref<9x8x4xbf16, #tpu.memory_space<vmem>>, vector<1x8x4xbf16>
    %9 = vector.shape_cast %8 : vector<1x8x4xbf16> to vector<8x4xbf16>
    %c0_13 = arith.constant 0 : index
    %c0_14 = arith.constant 0 : index
    %10 = vector.load %arg9[%c0_13, %c0_14] : memref<4x512xbf16, #tpu.memory_space<vmem>>, vector<4x384xbf16>
    %cst = arith.constant dense<0.000000e+00> : vector<8x384xf32>
    %11 = tpu.matmul %9, %10, %cst {dimension_numbers = #tpu.dot_dimension_numbers<[1], [0], [0], [1], [0, 0, 1, 1], [], []>} : vector<8x4xbf16>, vector<4x384xbf16>, vector<8x384xf32> -> vector<8x384xf32>
    %12 = arith.addf %7, %11 : vector<8x384xf32>
    %c1 = arith.constant 1 : index
    %c0_15 = arith.constant 0 : index
    %c0_16 = arith.constant 0 : index
    %13 = vector.load %arg3[%c1, %c0_15, %c0_16] : memref<9x8x4xbf16, #tpu.memory_space<vmem>>, vector<1x8x4xbf16>
    %14 = vector.shape_cast %13 : vector<1x8x4xbf16> to vector<8x4xbf16>
    %c0_17 = arith.constant 0 : index
    %c1_18 = arith.constant 1 : index
    %15 = vector.load %arg9[%c0_17, %c1_18] : memref<4x512xbf16, #tpu.memory_space<vmem>>, vector<4x384xbf16>
    %cst_19 = arith.constant dense<0.000000e+00> : vector<8x384xf32>
    %16 = tpu.matmul %14, %15, %cst_19 {dimension_numbers = #tpu.dot_dimension_numbers<[1], [0], [0], [1], [0, 0, 1, 1], [], []>} : vector<8x4xbf16>, vector<4x384xbf16>, vector<8x384xf32> -> vector<8x384xf32>
    %17 = arith.addf %12, %16 : vector<8x384xf32>
    %c2 = arith.constant 2 : index
    %c0_20 = arith.constant 0 : index
    %c0_21 = arith.constant 0 : index
    %18 = vector.load %arg3[%c2, %c0_20, %c0_21] : memref<9x8x4xbf16, #tpu.memory_space<vmem>>, vector<1x8x4xbf16>
    %19 = vector.shape_cast %18 : vector<1x8x4xbf16> to vector<8x4xbf16>
    %c0_22 = arith.constant 0 : index
    %c2_23 = arith.constant 2 : index
    %20 = vector.load %arg9[%c0_22, %c2_23] : memref<4x512xbf16, #tpu.memory_space<vmem>>, vector<4x384xbf16>
    %cst_24 = arith.constant dense<0.000000e+00> : vector<8x384xf32>
    %21 = tpu.matmul %19, %20, %cst_24 {dimension_numbers = #tpu.dot_dimension_numbers<[1], [0], [0], [1], [0, 0, 1, 1], [], []>} : vector<8x4xbf16>, vector<4x384xbf16>, vector<8x384xf32> -> vector<8x384xf32>
    %22 = arith.addf %17, %21 : vector<8x384xf32>
    %c3 = arith.constant 3 : index
    %c0_25 = arith.constant 0 : index
    %c0_26 = arith.constant 0 : index
    %23 = vector.load %arg3[%c3, %c0_25, %c0_26] : memref<9x8x4xbf16, #tpu.memory_space<vmem>>, vector<1x8x4xbf16>
    %24 = vector.shape_cast %23 : vector<1x8x4xbf16> to vector<8x4xbf16>
    %c0_27 = arith.constant 0 : index
    %c18 = arith.constant 18 : index
    %25 = vector.load %arg9[%c0_27, %c18] : memref<4x512xbf16, #tpu.memory_space<vmem>>, vector<4x384xbf16>
    %cst_28 = arith.constant dense<0.000000e+00> : vector<8x384xf32>
    %26 = tpu.matmul %24, %25, %cst_28 {dimension_numbers = #tpu.dot_dimension_numbers<[1], [0], [0], [1], [0, 0, 1, 1], [], []>} : vector<8x4xbf16>, vector<4x384xbf16>, vector<8x384xf32> -> vector<8x384xf32>
    %27 = arith.addf %22, %26 : vector<8x384xf32>
    %c4 = arith.constant 4 : index
    %c0_29 = arith.constant 0 : index
    %c0_30 = arith.constant 0 : index
    %28 = vector.load %arg3[%c4, %c0_29, %c0_30] : memref<9x8x4xbf16, #tpu.memory_space<vmem>>, vector<1x8x4xbf16>
    %29 = vector.shape_cast %28 : vector<1x8x4xbf16> to vector<8x4xbf16>
    %c0_31 = arith.constant 0 : index
    %c19 = arith.constant 19 : index
    %30 = vector.load %arg9[%c0_31, %c19] : memref<4x512xbf16, #tpu.memory_space<vmem>>, vector<4x384xbf16>
    %cst_32 = arith.constant dense<0.000000e+00> : vector<8x384xf32>
    %31 = tpu.matmul %29, %30, %cst_32 {dimension_numbers = #tpu.dot_dimension_numbers<[1], [0], [0], [1], [0, 0, 1, 1], [], []>} : vector<8x4xbf16>, vector<4x384xbf16>, vector<8x384xf32> -> vector<8x384xf32>
    %32 = arith.addf %27, %31 : vector<8x384xf32>
    %c5 = arith.constant 5 : index
    %c0_33 = arith.constant 0 : index
    %c0_34 = arith.constant 0 : index
    %33 = vector.load %arg3[%c5, %c0_33, %c0_34] : memref<9x8x4xbf16, #tpu.memory_space<vmem>>, vector<1x8x4xbf16>
    %34 = vector.shape_cast %33 : vector<1x8x4xbf16> to vector<8x4xbf16>
    %c0_35 = arith.constant 0 : index
    %c20 = arith.constant 20 : index
    %35 = vector.load %arg9[%c0_35, %c20] : memref<4x512xbf16, #tpu.memory_space<vmem>>, vector<4x384xbf16>
    %cst_36 = arith.constant dense<0.000000e+00> : vector<8x384xf32>
    %36 = tpu.matmul %34, %35, %cst_36 {dimension_numbers = #tpu.dot_dimension_numbers<[1], [0], [0], [1], [0, 0, 1, 1], [], []>} : vector<8x4xbf16>, vector<4x384xbf16>, vector<8x384xf32> -> vector<8x384xf32>
    %37 = arith.addf %32, %36 : vector<8x384xf32>
    %c6 = arith.constant 6 : index
    %c0_37 = arith.constant 0 : index
    %c0_38 = arith.constant 0 : index
    %38 = vector.load %arg3[%c6, %c0_37, %c0_38] : memref<9x8x4xbf16, #tpu.memory_space<vmem>>, vector<1x8x4xbf16>
    %39 = vector.shape_cast %38 : vector<1x8x4xbf16> to vector<8x4xbf16>
    %c0_39 = arith.constant 0 : index
    %c36 = arith.constant 36 : index
    %40 = vector.load %arg9[%c0_39, %c36] : memref<4x512xbf16, #tpu.memory_space<vmem>>, vector<4x384xbf16>
    %cst_40 = arith.constant dense<0.000000e+00> : vector<8x384xf32>
    %41 = tpu.matmul %39, %40, %cst_40 {dimension_numbers = #tpu.dot_dimension_numbers<[1], [0], [0], [1], [0, 0, 1, 1], [], []>} : vector<8x4xbf16>, vector<4x384xbf16>, vector<8x384xf32> -> vector<8x384xf32>
    %42 = arith.addf %37, %41 : vector<8x384xf32>
    %c7 = arith.constant 7 : index
    %c0_41 = arith.constant 0 : index
    %c0_42 = arith.constant 0 : index
    %43 = vector.load %arg3[%c7, %c0_41, %c0_42] : memref<9x8x4xbf16, #tpu.memory_space<vmem>>, vector<1x8x4xbf16>
    %44 = vector.shape_cast %43 : vector<1x8x4xbf16> to vector<8x4xbf16>
    %c0_43 = arith.constant 0 : index
    %c37 = arith.constant 37 : index
    %45 = vector.load %arg9[%c0_43, %c37] : memref<4x512xbf16, #tpu.memory_space<vmem>>, vector<4x384xbf16>
    %cst_44 = arith.constant dense<0.000000e+00> : vector<8x384xf32>
    %46 = tpu.matmul %44, %45, %cst_44 {dimension_numbers = #tpu.dot_dimension_numbers<[1], [0], [0], [1], [0, 0, 1, 1], [], []>} : vector<8x4xbf16>, vector<4x384xbf16>, vector<8x384xf32> -> vector<8x384xf32>
    %47 = arith.addf %42, %46 : vector<8x384xf32>
    %c8 = arith.constant 8 : index
    %c0_45 = arith.constant 0 : index
    %c0_46 = arith.constant 0 : index
    %48 = vector.load %arg3[%c8, %c0_45, %c0_46] : memref<9x8x4xbf16, #tpu.memory_space<vmem>>, vector<1x8x4xbf16>
    %49 = vector.shape_cast %48 : vector<1x8x4xbf16> to vector<8x4xbf16>
    %c0_47 = arith.constant 0 : index
    %c38 = arith.constant 38 : index
    %50 = vector.load %arg9[%c0_47, %c38] : memref<4x512xbf16, #tpu.memory_space<vmem>>, vector<4x384xbf16>
    %cst_48 = arith.constant dense<0.000000e+00> : vector<8x384xf32>
    %51 = tpu.matmul %49, %50, %cst_48 {dimension_numbers = #tpu.dot_dimension_numbers<[1], [0], [0], [1], [0, 0, 1, 1], [], []>} : vector<8x4xbf16>, vector<4x384xbf16>, vector<8x384xf32> -> vector<8x384xf32>
    %52 = arith.addf %47, %51 : vector<8x384xf32>
    %c0_49 = arith.constant 0 : index
    %53 = memref.load %arg5[%c0_49] : memref<1xf32, #tpu.memory_space<smem>>
    %54 = vector.broadcast %53 : f32 to vector<8x384xf32>
    %55 = arith.subf %52, %54 : vector<8x384xf32>
    %cst_50 = arith.constant 0.000000e+00 : f32
    %56 = vector.broadcast %cst_50 : f32 to vector<8x384xf32>
    %57 = arith.cmpf oge, %55, %56 : vector<8x384xf32>
    %58 = arith.extui %57 : vector<8x384xi1> to vector<8x384xi32>
    %59 = arith.sitofp %58 : vector<8x384xi32> to vector<8x384xf32>
    %60 = arith.truncf %59 : vector<8x384xf32> to vector<8x384xbf16>
    %c0_51 = arith.constant 0 : index
    %c0_52 = arith.constant 0 : index
    %61 = vector.load %arg7[%c0_51, %c0_52] : memref<8x384xbf16, #tpu.memory_space<vmem>>, vector<8x384xbf16>
    tpu.vector_store %arg7[%c0_51, %c0_52], %60 {strides = array<i32>} : memref<8x384xbf16, #tpu.memory_space<vmem>>, vector<8x384xbf16>,
    %62 = arith.subf %52, %59 : vector<8x384xf32>
    %c0_53 = arith.constant 0 : index
    %c0_54 = arith.constant 0 : index
    %63 = vector.load %arg8[%c0_53, %c0_54] : memref<8x384xf32, #tpu.memory_space<vmem>>, vector<8x384xf32>
    tpu.vector_store %arg8[%c0_53, %c0_54], %62 {strides = array<i32>} : memref<8x384xf32, #tpu.memory_space<vmem>>, vector<8x384xf32>,
    return
  }
  func.func @transform_0(%arg0: i32) -> (i32, i32) {
    %c0_i32 = arith.constant 0 : i32
    %c0_i32_0 = arith.constant 0 : i32
    return %c0_i32, %arg0 : i32, i32
  }
  func.func @transform_1(%arg0: i32) -> (i32, i32) {
    %c1_i32 = arith.constant 1 : i32
    %0 = arith.addi %arg0, %c1_i32 : i32
    %c3_i32 = arith.constant 3 : i32
    %1 = arith.muli %0, %c3_i32 : i32
    %c0_i32 = arith.constant 0 : i32
    %c0_i32_0 = arith.constant 0 : i32
    return %c0_i32, %1 : i32, i32
  }
  func.func @transform_2(%arg0: i32) -> (i32, i32, i32) {
    %c0_i32 = arith.constant 0 : i32
    %c0_i32_0 = arith.constant 0 : i32
    %c0_i32_1 = arith.constant 0 : i32
    %c0_i32_2 = arith.constant 0 : i32
    return %c0_i32, %c0_i32_0, %c0_i32_1 : i32, i32, i32
  }
  func.func @transform_3(%arg0: i32) -> (i32, i32) {
    %c0_i32 = arith.constant 0 : i32
    %c0_i32_0 = arith.constant 0 : i32
    %c0_i32_1 = arith.constant 0 : i32
    return %c0_i32, %c0_i32_0 : i32, i32
  }
  func.func @transform_4(%arg0: i32) -> i32 {
    %c0_i32 = arith.constant 0 : i32
    %c0_i32_0 = arith.constant 0 : i32
    return %c0_i32 : i32
  }
  func.func @transform_5(%arg0: i32) -> (i32, i32) {
    %c0_i32 = arith.constant 0 : i32
    %c0_i32_0 = arith.constant 0 : i32
    return %c0_i32, %arg0 : i32, i32
  }
  func.func @transform_6(%arg0: i32) -> (i32, i32) {
    %c0_i32 = arith.constant 0 : i32
    %c0_i32_0 = arith.constant 0 : i32
    return %c0_i32, %arg0 : i32, i32
  }
  func.func @transform_7(%arg0: i32) -> (i32, i32) {
    %c0_i32 = arith.constant 0 : i32
    %c0_i32_0 = arith.constant 0 : i32
    return %c0_i32, %arg0 : i32, i32
  }
}

</mosaic_0001>

<bundles_post_ra>
// kernel: tpu_custom_call.1
= control target key start
LH: loop header
LB: loop body
LE: loop exit
PB: predicated region body
PF: predicated region fallthrough
CT: control target
= control target key end

     0   :  { %s2426_s0 = inlined_call_operand.vmem [shape: bf16[4,896], index: 0, kind: input, shape index: {}]   ;;  %s2427_s1 = inlined_call_operand.vmem [shape: bf16[4,896], index: 1, kind: input, shape index: {}]   ;;  %s2428_s2 = inlined_call_operand.vmem [shape: bf16[9,8,4], index: 2, kind: input, shape index: {}]   ;;  %s2429_s3 = inlined_call_operand.vmem [shape: f32[8,1], index: 3, kind: input, shape index: {}]   ;;  %s2430_s4 = inlined_call_operand.<no memory space> [shape: f32[1], index: 4, kind: input, shape index: {}]   ;;  %s2431_s5 = inlined_call_operand.hbm [shape: f32[8,768], index: 5, kind: input, shape index: {}, may-alias: {5,7}]   ;;  %s2432_s6 = inlined_call_operand.hbm [shape: bf16[8,768], index: 6, kind: output, shape index: {0}]   ;;  %s2433_s7 = inlined_call_operand.hbm [shape: f32[8,768], index: 7, kind: output, shape index: {1}, may-alias: {5,7}]  }
   0x1   :  { %13 = sst [smem:[#allocation3]] %s2430_s4 }
   0x2   :  { %14 = vsyncpa [#allocation5], 0 }
   0x3   :  { %16 = vsyncpa [#allocation5 + $0x1], 0 }
   0x4   :  { %17 = vsyncpa [#allocation6], 0 }
   0x5   :  { %19 = vsyncpa [#allocation6 + $0x1], 0 }
   0x6   :  { %20 = vsyncpa [#allocation9], 0 }
   0x7   :  { %22 = vsyncpa [#allocation9 + $0x1], 0  ;;  %s2123_s26 = smov 0   ;;  %s2125_s27 = smov 0  }
   0x8   :  { %s2127_s28 = smov 0   ;;  %s2129_s29 = smov 0  }
   0x9 LB: > { %s2144_s4 = sadd.s32 4294967295, %s2063_s29   ;;  %s1744_s30 = sadd.s32 4294967294, %s2063_s29   ;;  %s2063_s29 = sphi %s2129_s29, %s2449_s29   ;;  %s2059_s28 = sphi %s2127_s28, %s2448_s28   ;;  %s2055_s27 = sphi %s2125_s27, %s2447_s27   ;;  %s2051_s26 = sphi %s2123_s26, %s2446_s26  }
   0xa   : > { %s2148_s8 = sadd.s32 1, %s2063_s29   ;;  %s154_s9 = sadd.s32 1, %s2059_s28 }
   0xb   : > { %s151_s10 = ssub.s32 %s2063_s29, %s2148_s8  ;;  %p161_p0 = scmp.ne.s32.totalorder %s2059_s28, %s2055_s27 }
   0xc   : > { %p152_p1 = scmp.eq.s32.totalorder %s151_s10, 0  ;;  %p162_p2 = scmp.eq.s32.totalorder %s2063_s29, 0 }
   0xd   : > { %p167_p3 = scmp.ne.s32.totalorder %s2055_s27, %s2051_s26  ;;  %p168_p4 = scmp.eq.s32.totalorder %s2144_s4, 0 }
   0xe   : > { %s2160_s11 = scalar_select %p152_p1, %s2059_s28, %s154_s9  }
   0xf   : > { %p163_p5 = por %p162_p2, %p161_p0  ;;  %p2162_p6 = por %p168_p4, %p167_p3 }
  0x10   : > { %p191_p7 = scmp.eq.s32.totalorder %s2144_s4, 1  ;;  %p197_p8 = scmp.eq.s32.totalorder %s1744_s30, 1 }
  0x11   : > { %s2436_s12 = scalar_select %p2162_p6, 1, 0 }
  0x12   : > { %p1892_p10 = scmp.lt.s32.totalorder %s2063_s29, 2  ;;  %p2169_p11 = por %p191_p7, %p161_p0 }
  0x13   : > { %p2173_p12 = por %p197_p8, %p167_p3  ;;  %s280_s15 = sand.u32 1, %s2059_s28  }
  0x14   : > { %s2437_s13 = scalar_select %p2169_p11, 1, 0 }
  0x15   : > { %s2438_s14 = scalar_select %p2173_p12, 1, 0 }
  0x16   : > { %s1795_s16 = smul.u32 384, %s2063_s29  ;;  %p2184_p13 = pnand %p1892_p10, %p163_p5 }
  0x17   : > { %s1872_s17 = smul.u32 24, %s280_s15  ;;  %s281_s24 = scalar_lea.sflag [#allocation5], %s280_s15 }
  0x18   : > { %s2182_s20 = scalar_lea.hbm %s2431_s5, %s1795_s16  ;;  %p1943_p3 = pneg %p2184_p13 }
  0x19   : > { %s284_s22 = scalar_lea.vmem [#allocation4], %s1872_s17  ;;  %s1941_s25 = scalar_lea.hbm %s2182_s20, 384 }
  0x1a   : > { %s292_s23 = sshll.u32 %s284_s22, 4  ;;  %p1942_p2 = scmp.ne.s32.totalorder %s2182_s20, %s1941_s25  ;;  %s293_s23 = int_to_ptr.vmem [resolvable:$true] %s292_s23 }
  0x1b   : > { %s1946_s10 = scalar_lea.hbm %s2431_s5, 768  ;;  %p1947_p5 = scmp.lt.s32.totalorder %s2182_s20, %s2431_s5 }
  0x1c   : > { %p1944_p4 = pnand %p1943_p3, %p1942_p2  ;;  %p1948_p8 = scmp.lt.s32.totalorder %s1946_s10, %s1941_s25 }
  0x1e   : > { %p1945_p7 = pneg %p1944_p4  ;;  %p1949_p10 = por %p1948_p8, %p1947_p5 }
  0x20   : > { %p1950_p9 = pnand %p1949_p10, %p1945_p7 }
  0x22   : > { %1953 = shalt.err (!%p1950_p9)
}
  0x23   : > { %s1954_s17 = scalar_lea.vmem %s293_s23, 384  ;;  %s2065_s15 = smov [#allocation4]  }
  0x24   : > { %p1955_p0 = scmp.ne.s32.totalorder %s293_s23, %s1954_s17  ;;  %s1959_s19 = sshll.u32 %s2065_s15, 4  ;;  %s1960_s19 = int_to_ptr.vmem [resolvable:$false] %s1959_s19 }
  0x25   : > { %s1961_s22 = scalar_lea.vmem %s1960_s19, 768  ;;  %p1962_p2 = scmp.lt.s32.totalorder %s293_s23, %s1960_s19 }
  0x26   : > { %p1957_p1 = pnand %p1955_p0, %p1943_p3  ;;  %p1963_p4 = scmp.lt.s32.totalorder %s1961_s22, %s1954_s17 }
  0x28   : > { %p1958_p12 = pneg %p1957_p1  ;;  %p1964_p11 = por %p1963_p4, %p1962_p2 }
  0x2a   : > { %p1965_p6 = pnand %p1964_p11, %p1958_p12 }
  0x2c   : > { %1968 = shalt.err (!%p1965_p6)
}
  0x2d   : > { %1884 = dma.hbm_to_vmem [thread:$0]  (!%p2184_p13), %s2182_s20, 384, %s293_s23, %s281_s24  }
  0x2e   : > { %p2440_p9 = scmp.lt.s32.totalorder %s2063_s29, 3  ;;  %p2441_p7 = scmp.ge.s32.totalorder %s2063_s29, 1 }
  0x30   : > { %p298_p5 = pnand %p2441_p7, %p2440_p9 }
  0x31   : > { %s2209_s25 = sand.u32 (!%p298_p5), 1, %s2055_s27   ;;  %p2442_p6 = scmp.ne.s32.totalorder (!%p298_p5), %s2436_s12, 0 }
  0x32   : > { %301 = sbr.rel (%p298_p5) target bundleno = 494 (0x1ee), region = 44  ;;  %s304_s9 = scalar_lea.sflag (!%p298_p5), [#allocation5], %s2209_s25 }
  0x33   : > { %s1873_s30 = smul.u32 (!%p298_p5), 24, %s2209_s25 }
  0x35   : > { %s2215_s10 = scalar_lea.vmem (!%p298_p5), [#allocation4], %s1873_s30 }
  0x37   : > { %2038 = dma.done.wait (%p2442_p6), %s304_s9, 384  }
  0x38   : > { %2040 = vsyncadd (%p2442_p6), %s304_s9, 4294966912  ;;  %s358_s20 = smul.u32 3, %s2144_s4  ;;  %s372_s21 = sadd.s32 1, %s2144_s4  ;;  %v2066_v0 = vmov 0.0   ;;  %v2067_v1 = vmov 0   ;;  %vm2068_vm0 = vmmov 0   ;;  %v407_v4 = vlaneseq }
  0x39   : > { %s373_s23 = smul.u32 3, %s372_s21  ;;  %1818 = vmatprep.subr.bf16.mxu1 %v2066_v0  ;;  %465 = vmatprep.mubr.bf16.mxu0 %v2067_v1  ;;  %v2069_v2 = vmov 1983009808   ;;  %vm423_vm1 = vcmask 1041408   ;;  %s2070_s9 = smov 127   ;;  %vm419_vm2 = vcmask 31744  }
  0x3a   : > { %p363_p11 = scmp.lt.s32.totalorder %s358_s20, 6  ;;  %1820 = vmatprep.mubr.msk.bf16.mxu1 %vm2068_vm0, %v2066_v0  ;;  %1938 = vset.pattern.permute.xlu0 %v2067_v1  ;;  %v405_v3 = vunpack.c.l.s4 %v2069_v2  ;;  %v408_v8 = vshrl.u32 %v407_v4, 7  ;;  %v400_v23 = vld [vmem:[%s2428_s2] sm:$0xf]  ;;  %s2073_s24 = smov 109   ;;  %vm546_vm3 = vcmask 1039360  }
  0x3b   : > { %p374_p12 = scmp.lt.s32.totalorder %s373_s23, 6  ;;  %s2074_s16 = smov 108   ;;  %v391_v24 = vld [vmem:[%s2429_s3] sm:$0xff]  ;;  %vm675_vm4 = vcmask 1031168   ;;  %v1758_v43 = vld [vmem:[%s2428_s2 + $0x8] sm:$0xf] }
  0x3c   : > { %s2451_s20 = smov (!%p363_p11, %s358_s20), 6  ;;  %v406_v7 = vunpack.c.0.s8 %v405_v3  ;;  %s2077_s15 = smov 90   ;;  %v1754_v33 = vld [vmem:[%s2428_s2 + $0x4] sm:$0xf]  ;;  %vm804_vm5 = vcmask 900096   ;;  %vm933_vm6 = vcmask 891904  }
  0x3d   : > { %s2453_s23 = smov (!%p374_p12, %s373_s23), 6  ;;  %s1749_s12 = sshll.u32 %s2451_s20, 1  ;;  %v1762_v53 = vld [vmem:[%s2428_s2 + $0xc] sm:$0xf]  ;;  %v1766_v63 = vld [vmem:[%s2428_s2 + $0x10] sm:$0xf] }
  0x3e   : > { %s366_s18 = scalar_lea.vmem %s2426_s0, %s1749_s12  ;;  %s1750_s17 = sshll.u32 %s2453_s23, 1  ;;  %v409_v9 = vsub.s32 %v406_v7, %v408_v8  ;;  %vm1062_vm7 = vcmask 883712   ;;  %vm1191_vm8 = vcmask 752640   ;;  %vm1320_vm9 = vcmask 744448  }
  0x3f   : > { %s377_s22 = scalar_lea.vmem %s2427_s1, %s1750_s17  ;;  %v384_v5 = vld [vmem:[%s366_s18] sm:$0x3f]  ;;  %s2071_s23 = smov 126   ;;  %vm1449_vm10 = vcmask 736256  }
  0x40   : > { %385 = vst [vmem:[#allocation2] sm:$0x3f] %v384_v5  ;;  %v386_v6 = vld [vmem:[%s377_s22] sm:$0x3]  ;;  %s2072_s12 = smov 110   ;;  %s2075_s18 = smov 92  }
  0x41   : > { %387 = vst [vmem:[#allocation2 + $0x6] sm:$0x3] %v386_v6  ;;  %s2076_s17 = smov 91   ;;  %p2443_p0 = scmp.ne.s32.totalorder %s2437_s13, 0 }
  0x47   : > { %v401_v10 = vld [vmem:[#allocation2] sm:$0x3f] }
  0x48   : > { %v519_v11 = vld [vmem:[#allocation2] sm:$0xff]  ;;  %v410_v12 = vrot.slane %v401_v10, %v409_v9  ;;  %v403_v13 = vcombine.high %v401_v10, %v401_v10 }
  0x49   : > { %v528_v14 = vrot.slane %v519_v11, %v409_v9  ;;  %v521_v15 = vcombine.high %v519_v11, %v519_v11  ;;  %v1770_v11 = vld [vmem:[%s2428_s2 + $0x14] sm:$0xf] }
  0x4a   : > { %v418_v16 = vcombine.high %v410_v12, %v410_v12  ;;  %v425_v17 = vsel %vm423_vm1, %v410_v12, 0  ;;  %v417_v18 = vrot.slane %v403_v13, %v409_v9 }
  0x4b   : > { %538 = vrot.lane.b32.xlu0 %v528_v14, %s2070_s9  ;;  %v536_v19 = vcombine.high %v528_v14, %v528_v14  ;;  %v535_v20 = vrot.slane %v521_v15, %v409_v9 }
  0x4c   : > { %1751 = vmatprep.subr.msk.bf16.mxu0 %vm423_vm1, %v418_v16  ;;  %v431_v21 = vsel %vm423_vm1, %v417_v18, 0 }
  0x4d   : > { %542 = vrot.lane.b32.xlu1 %v535_v20, %s2070_s9  ;;  %v537_v22 = vcombine.high %v535_v20, %v535_v20  ;;  %448 = vmatpush1.bf16.msra.mxu0 %v425_v17 }
  0x4e   : > { %1819 = vmatpush3.bf16.msra.mxu1 %v431_v21  ;;  %v1774_v21 = vld [vmem:[%s2428_s2 + $0x18] sm:$0xf] }
  0x4f   : > { %540 = vrot.lane.b32.xlu0 %v536_v19, %s2070_s9  ;;  %1824 = vmatprep.subr.bf16.mxu1 %v2066_v0 }
  0x50   : > { %1752 = vmatmul.mubr.msk.bf16.vlgmr.msra.gmra.mxu0 %vm419_vm2, %v400_v23 }
  0x51   : > { %544 = vrot.lane.b32.xlu1 %v537_v22, %s2070_s9  ;;  %1821 = vmatmul.mubr.msk.bf16.vlgmr.msra.gmra.mxu1 %vm419_vm2, %v400_v23 }
  0x52   : > { %594 = vmatprep.mubr.bf16.mxu0 %v2067_v1  ;;  %1826 = vmatprep.mubr.msk.bf16.mxu1 %vm2068_vm0, %v2066_v0 }
  0x53   : > { %667 = vrot.lane.b32.xlu0 %v528_v14, %s2071_s23 }
  0x55   : > { %669 = vrot.lane.b32.xlu1 %v536_v19, %s2071_s23 }
  0x57   : > { %671 = vrot.lane.b32.xlu0 %v535_v20, %s2071_s23 }
  0x59   : > { %673 = vrot.lane.b32.xlu1 %v537_v22, %s2071_s23  ;;  %s1585_s23 = scalar_lea.sflag [#allocation6], %s2209_s25 }
  0x5b   : > { %796 = vrot.lane.b32.xlu0 %v528_v14, %s2072_s12 }
  0x5d   : > { %798 = vrot.lane.b32.xlu1 %v536_v19, %s2072_s12 }
  0x5f   : > { %800 = vrot.lane.b32.xlu0 %v535_v20, %s2072_s12 }
  0x61   : > { %802 = vrot.lane.b32.xlu1 %v537_v22, %s2072_s12  ;;  %s1874_s12 = smul.u32 12, %s2209_s25 }
  0x63   : > { %925 = vrot.lane.b32.xlu0 %v528_v14, %s2073_s24 }
  0x65   : > { %927 = vrot.lane.b32.xlu1 %v536_v19, %s2073_s24 }
  0x67   : > { %929 = vrot.lane.b32.xlu0 %v535_v20, %s2073_s24 }
  0x69   : > { %931 = vrot.lane.b32.xlu1 %v537_v22, %s2073_s24  ;;  %s1798_s24 = smul.u32 192, %s2144_s4 }
  0x6b   : > { %1054 = vrot.lane.b32.xlu0 %v528_v14, %s2074_s16  ;;  %s2355_s20 = scalar_lea.hbm %s2432_s6, %s1798_s24 }
  0x6d   : > { %1056 = vrot.lane.b32.xlu1 %v536_v19, %s2074_s16 }
  0x6f   : > { %1058 = vrot.lane.b32.xlu0 %v535_v20, %s2074_s16 }
  0x71   : > { %1060 = vrot.lane.b32.xlu1 %v537_v22, %s2074_s16  ;;  %s350_s16 = scalar_lea.vmem [#allocation7], %s1874_s12  ;;  %s2078_s12 = smov [#allocation7]  }
  0x72   : > { %s1973_s24 = sshll.u32 %s2078_s12, 4  ;;  %s1974_s24 = int_to_ptr.vmem [resolvable:$false] %s1973_s24 }
  0x73   : > { %1183 = vrot.lane.b32.xlu0 %v528_v14, %s2075_s18  ;;  %s1975_s22 = scalar_lea.vmem %s1974_s24, 384 }
  0x75   : > { %1185 = vrot.lane.b32.xlu1 %v536_v19, %s2075_s18 }
  0x77   : > { %1187 = vrot.lane.b32.xlu0 %v535_v20, %s2075_s18 }
  0x79   : > { %1189 = vrot.lane.b32.xlu1 %v537_v22, %s2075_s18  ;;  %s1604_s18 = sshll.u32 %s350_s16, 4  ;;  %s2357_s18 = int_to_ptr.vmem [resolvable:$true] %s1604_s18 }
  0x7a   : > { %p1976_p8 = scmp.lt.s32.totalorder %s2357_s18, %s1974_s24 }
  0x7b   : > { %1312 = vrot.lane.b32.xlu0 %v528_v14, %s2076_s17 }
  0x7d   : > { %1314 = vrot.lane.b32.xlu1 %v536_v19, %s2076_s17 }
  0x7f   : > { %1316 = vrot.lane.b32.xlu0 %v535_v20, %s2076_s17 }
  0x81   : > { %1318 = vrot.lane.b32.xlu1 %v537_v22, %s2076_s17  ;;  %s1799_s17 = smul.u32 384, %s2144_s4 }
  0x83   : > { %1441 = vrot.lane.b32.xlu0 %v528_v14, %s2077_s15  ;;  %s2362_s21 = scalar_lea.hbm %s2433_s7, %s1799_s17 }
  0x85   : > { %1443 = vrot.lane.b32.xlu1 %v536_v19, %s2077_s15 }
  0x87   : > { %1445 = vrot.lane.b32.xlu0 %v535_v20, %s2077_s15 }
  0x89   : > { %1447 = vrot.lane.b32.xlu1 %v537_v22, %s2077_s15  ;;  %s357_s15 = scalar_lea.vmem [#allocation8], %s1873_s30 }
  0x8a   : > { %s1618_s19 = sshll.u32 %s357_s15, 4  ;;  %s2364_s19 = int_to_ptr.vmem [resolvable:$true] %s1618_s19 }
  0x8b   : > { %394 = vperm.xlu0 %1938, %v391_v24  }
  0xbd   : > { %v539_v25 = vpop.permute.xlu0 %538 }
  0xbf   : > { %v543_v26 = vpop.permute.xlu1 %542 }
  0xc1   : > { %v541_v27 = vpop.permute.xlu0 %540 }
  0xc2   : > { %v547_v28 = vsel %vm546_vm3, %v539_v25, %v541_v27  ;;  %v548_v29 = vsel %vm546_vm3, %v541_v27, %v543_v26 }
  0xc3   : > { %v554_v30 = vsel %vm423_vm1, %v547_v28, 0  ;;  %v545_v31 = vpop.permute.xlu1 %544  ;;  %1755 = vmatprep.subr.msk.bf16.mxu0 %vm423_vm1, %v548_v29 }
  0xc4   : > { %v549_v32 = vsel %vm546_vm3, %v543_v26, %v545_v31  ;;  %577 = vmatpush1.bf16.msra.mxu0 %v554_v30  ;;  %v1778_v31 = vld [vmem:[%s2428_s2 + $0x1c] sm:$0xf] }
  0xc5   : > { %v560_v34 = vsel %vm423_vm1, %v549_v32, 0  ;;  %v668_v35 = vpop.permute.xlu0 %667 }
  0xc6   : > { %1825 = vmatpush3.bf16.msra.mxu1 %v560_v34 }
  0xc7   : > { %v670_v36 = vpop.permute.xlu1 %669  ;;  %1756 = vmatmul.mubr.msk.bf16.vlgmr.msra.gmra.mxu0 %vm419_vm2, %v1754_v33  ;;  %1830 = vmatprep.subr.bf16.mxu1 %v2066_v0 }
  0xc8   : > { %v676_v37 = vsel %vm675_vm4, %v668_v35, %v670_v36  ;;  %723 = vmatprep.mubr.bf16.mxu0 %v2067_v1 }
  0xc9   : > { %v672_v38 = vpop.permute.xlu0 %671  ;;  %1827 = vmatmul.mubr.msk.bf16.vlgmr.msra.gmra.mxu1 %vm419_vm2, %v1754_v33  ;;  %v683_v40 = vsel %vm423_vm1, %v676_v37, 0 }
  0xca   : > { %v677_v39 = vsel %vm675_vm4, %v670_v36, %v672_v38  ;;  %1832 = vmatprep.mubr.msk.bf16.mxu1 %vm2068_vm0, %v2066_v0 }
  0xcb   : > { %v674_v41 = vpop.permute.xlu1 %673  ;;  %1759 = vmatprep.subr.msk.bf16.mxu0 %vm423_vm1, %v677_v39 }
  0xcc   : > { %v678_v42 = vsel %vm675_vm4, %v672_v38, %v674_v41  ;;  %706 = vmatpush1.bf16.msra.mxu0 %v683_v40  ;;  %v1782_v41 = vld [vmem:[%s2428_s2 + $0x20] sm:$0xf] }
  0xcd   : > { %v689_v44 = vsel %vm423_vm1, %v678_v42, 0  ;;  %v797_v45 = vpop.permute.xlu0 %796 }
  0xce   : > { %1831 = vmatpush3.bf16.msra.mxu1 %v689_v44 }
  0xcf   : > { %v799_v46 = vpop.permute.xlu1 %798  ;;  %1760 = vmatmul.mubr.msk.bf16.vlgmr.msra.gmra.mxu0 %vm419_vm2, %v1758_v43  ;;  %1836 = vmatprep.subr.bf16.mxu1 %v2066_v0 }
  0xd0   : > { %v805_v47 = vsel %vm804_vm5, %v797_v45, %v799_v46  ;;  %852 = vmatprep.mubr.bf16.mxu0 %v2067_v1 }
  0xd1   : > { %v801_v48 = vpop.permute.xlu0 %800  ;;  %1833 = vmatmul.mubr.msk.bf16.vlgmr.msra.gmra.mxu1 %vm419_vm2, %v1758_v43  ;;  %v812_v50 = vsel %vm423_vm1, %v805_v47, 0 }
  0xd2   : > { %v806_v49 = vsel %vm804_vm5, %v799_v46, %v801_v48  ;;  %1838 = vmatprep.mubr.msk.bf16.mxu1 %vm2068_vm0, %v2066_v0 }
  0xd3   : > { %v803_v51 = vpop.permute.xlu1 %802  ;;  %1763 = vmatprep.subr.msk.bf16.mxu0 %vm423_vm1, %v806_v49 }
  0xd4   : > { %v807_v52 = vsel %vm804_vm5, %v801_v48, %v803_v51  ;;  %835 = vmatpush1.bf16.msra.mxu0 %v812_v50 }
  0xd5   : > { %v818_v54 = vsel %vm423_vm1, %v807_v52, 0  ;;  %v926_v55 = vpop.permute.xlu0 %925 }
  0xd6   : > { %1837 = vmatpush3.bf16.msra.mxu1 %v818_v54 }
  0xd7   : > { %v928_v56 = vpop.permute.xlu1 %927  ;;  %1764 = vmatmul.mubr.msk.bf16.vlgmr.msra.gmra.mxu0 %vm419_vm2, %v1762_v53  ;;  %1842 = vmatprep.subr.bf16.mxu1 %v2066_v0 }
  0xd8   : > { %v934_v57 = vsel %vm933_vm6, %v926_v55, %v928_v56  ;;  %981 = vmatprep.mubr.bf16.mxu0 %v2067_v1 }
  0xd9   : > { %v930_v58 = vpop.permute.xlu0 %929  ;;  %1839 = vmatmul.mubr.msk.bf16.vlgmr.msra.gmra.mxu1 %vm419_vm2, %v1762_v53  ;;  %v941_v60 = vsel %vm423_vm1, %v934_v57, 0 }
  0xda   : > { %v935_v59 = vsel %vm933_vm6, %v928_v56, %v930_v58  ;;  %1844 = vmatprep.mubr.msk.bf16.mxu1 %vm2068_vm0, %v2066_v0 }
  0xdb   : > { %v932_v61 = vpop.permute.xlu1 %931  ;;  %1767 = vmatprep.subr.msk.bf16.mxu0 %vm423_vm1, %v935_v59 }
  0xdc   : > { %v936_v62 = vsel %vm933_vm6, %v930_v58, %v932_v61  ;;  %964 = vmatpush1.bf16.msra.mxu0 %v941_v60 }
  0xdd   : > { %v947_v2 = vsel %vm423_vm1, %v936_v62, 0  ;;  %v1055_v3 = vpop.permute.xlu0 %1054 }
  0xde   : > { %1843 = vmatpush3.bf16.msra.mxu1 %v947_v2 }
  0xdf   : > { %v1057_v4 = vpop.permute.xlu1 %1056  ;;  %1768 = vmatmul.mubr.msk.bf16.vlgmr.msra.gmra.mxu0 %vm419_vm2, %v1766_v63  ;;  %1848 = vmatprep.subr.bf16.mxu1 %v2066_v0 }
  0xe0   : > { %v1063_v5 = vsel %vm1062_vm7, %v1055_v3, %v1057_v4  ;;  %1110 = vmatprep.mubr.bf16.mxu0 %v2067_v1 }
  0xe1   : > { %v1059_v6 = vpop.permute.xlu0 %1058  ;;  %1845 = vmatmul.mubr.msk.bf16.vlgmr.msra.gmra.mxu1 %vm419_vm2, %v1766_v63  ;;  %v1070_v8 = vsel %vm423_vm1, %v1063_v5, 0 }
  0xe2   : > { %v1064_v7 = vsel %vm1062_vm7, %v1057_v4, %v1059_v6  ;;  %1850 = vmatprep.mubr.msk.bf16.mxu1 %vm2068_vm0, %v2066_v0 }
  0xe3   : > { %v1061_v9 = vpop.permute.xlu1 %1060  ;;  %1771 = vmatprep.subr.msk.bf16.mxu0 %vm423_vm1, %v1064_v7 }
  0xe4   : > { %v1065_v10 = vsel %vm1062_vm7, %v1059_v6, %v1061_v9  ;;  %1093 = vmatpush1.bf16.msra.mxu0 %v1070_v8 }
  0xe5   : > { %v1076_v12 = vsel %vm423_vm1, %v1065_v10, 0  ;;  %v1184_v13 = vpop.permute.xlu0 %1183 }
  0xe6   : > { %1849 = vmatpush3.bf16.msra.mxu1 %v1076_v12 }
  0xe7   : > { %v1186_v14 = vpop.permute.xlu1 %1185  ;;  %1772 = vmatmul.mubr.msk.bf16.vlgmr.msra.gmra.mxu0 %vm419_vm2, %v1770_v11  ;;  %1854 = vmatprep.subr.bf16.mxu1 %v2066_v0 }
  0xe8   : > { %v1192_v15 = vsel %vm1191_vm8, %v1184_v13, %v1186_v14  ;;  %1239 = vmatprep.mubr.bf16.mxu0 %v2067_v1 }
  0xe9   : > { %v1188_v16 = vpop.permute.xlu0 %1187  ;;  %1851 = vmatmul.mubr.msk.bf16.vlgmr.msra.gmra.mxu1 %vm419_vm2, %v1770_v11  ;;  %v1199_v18 = vsel %vm423_vm1, %v1192_v15, 0 }
  0xea   : > { %v1193_v17 = vsel %vm1191_vm8, %v1186_v14, %v1188_v16  ;;  %1856 = vmatprep.mubr.msk.bf16.mxu1 %vm2068_vm0, %v2066_v0 }
  0xeb   : > { %v1190_v19 = vpop.permute.xlu1 %1189  ;;  %1775 = vmatprep.subr.msk.bf16.mxu0 %vm423_vm1, %v1193_v17 }
  0xec   : > { %v1194_v20 = vsel %vm1191_vm8, %v1188_v16, %v1190_v19  ;;  %1222 = vmatpush1.bf16.msra.mxu0 %v1199_v18 }
  0xed   : > { %v1205_v22 = vsel %vm423_vm1, %v1194_v20, 0  ;;  %v1313_v23 = vpop.permute.xlu0 %1312 }
  0xee   : > { %1855 = vmatpush3.bf16.msra.mxu1 %v1205_v22  ;;  %v388_v22 = vld [vmem:[%s2215_s10] sm:$0xff] }
  0xef   : > { %v1315_v24 = vpop.permute.xlu1 %1314  ;;  %1776 = vmatmul.mubr.msk.bf16.vlgmr.msra.gmra.mxu0 %vm419_vm2, %v1774_v21  ;;  %1860 = vmatprep.subr.bf16.mxu1 %v2066_v0 }
  0xf0   : > { %v1321_v25 = vsel %vm1320_vm9, %v1313_v23, %v1315_v24  ;;  %1368 = vmatprep.mubr.bf16.mxu0 %v2067_v1 }
  0xf1   : > { %v1317_v26 = vpop.permute.xlu0 %1316  ;;  %1857 = vmatmul.mubr.msk.bf16.vlgmr.msra.gmra.mxu1 %vm419_vm2, %v1774_v21  ;;  %v1328_v28 = vsel %vm423_vm1, %v1321_v25, 0  ;;  %v389_v25 = vld [vmem:[%s2215_s10 + $0x8] sm:$0xff] }
  0xf2   : > { %v1322_v27 = vsel %vm1320_vm9, %v1315_v24, %v1317_v26  ;;  %1862 = vmatprep.mubr.msk.bf16.mxu1 %vm2068_vm0, %v2066_v0 }
  0xf3   : > { %v1319_v29 = vpop.permute.xlu1 %1318  ;;  %1779 = vmatprep.subr.msk.bf16.mxu0 %vm423_vm1, %v1322_v27 }
  0xf4   : > { %v1323_v30 = vsel %vm1320_vm9, %v1317_v26, %v1319_v29  ;;  %1351 = vmatpush1.bf16.msra.mxu0 %v1328_v28  ;;  %v390_v26 = vld [vmem:[%s2215_s10 + $0x10] sm:$0xff]  ;;  %s1549_s10 = sld [smem:[#allocation3]] }
  0xf5   : > { %v1334_v32 = vsel %vm423_vm1, %v1323_v30, 0  ;;  %v1442_v33 = vpop.permute.xlu0 %1441 }
  0xf6   : > { %1861 = vmatpush3.bf16.msra.mxu1 %v1334_v32 }
  0xf7   : > { %v1444_v34 = vpop.permute.xlu1 %1443  ;;  %1780 = vmatmul.mubr.msk.bf16.vlgmr.msra.gmra.mxu0 %vm419_vm2, %v1778_v31  ;;  %1866 = vmatprep.subr.bf16.mxu1 %v2066_v0 }
  0xf8   : > { %v1450_v35 = vsel %vm1449_vm10, %v1442_v33, %v1444_v34  ;;  %1497 = vmatprep.mubr.bf16.mxu0 %v2067_v1 }
  0xf9   : > { %v1446_v36 = vpop.permute.xlu0 %1445  ;;  %1863 = vmatmul.mubr.msk.bf16.vlgmr.msra.gmra.mxu1 %vm419_vm2, %v1778_v31  ;;  %v1457_v38 = vsel %vm423_vm1, %v1450_v35, 0 }
  0xfa   : > { %v1451_v37 = vsel %vm1449_vm10, %v1444_v34, %v1446_v36  ;;  %1868 = vmatprep.mubr.msk.bf16.mxu1 %vm2068_vm0, %v2066_v0 }
  0xfb   : > { %v1448_v39 = vpop.permute.xlu1 %1447  ;;  %1783 = vmatprep.subr.msk.bf16.mxu0 %vm423_vm1, %v1451_v37 }
  0xfc   : > { %v1452_v40 = vsel %vm1449_vm10, %v1446_v36, %v1448_v39  ;;  %1480 = vmatpush1.bf16.msra.mxu0 %v1457_v38 }
  0xfd   : > { %v1463_v1 = vsel %vm423_vm1, %v1452_v40, 0 }
  0xfe   : > { %1867 = vmatpush3.bf16.msra.mxu1 %v1463_v1 }
  0xff   : > { %1784 = vmatmul.mubr.msk.bf16.vlgmr.msra.gmra.mxu0 %vm419_vm2, %v1782_v41 }
 0x101   : > { %1869 = vmatmul.mubr.msk.bf16.vlgmr.msra.gmra.mxu1 %vm419_vm2, %v1782_v41 }
 0x106   : > { %v395_v21 = vpop.permute.xlu0 %394 }
 0x107   : > { %v397_v29 = vadd.f32 %v395_v21, %v388_v22  ;;  %v398_v32 = vadd.f32 %v395_v21, %v389_v25  ;;  %v399_v33 = vadd.f32 %v395_v21, %v390_v26 }
 0x110   : > { %v467_v42 = vpop.f32.mrf.mxu0 }
 0x111   : > { %v508_v43 = vpop.f32.mrf.mxu1  ;;  %v514_v36 = vadd.f32 %v467_v42, %v397_v29 }
 0x112   : > { %v469_v44 = vpop.f32.mrf.mxu0  ;;  %v516_v41 = vadd.f32 %v508_v43, %v399_v33 }
 0x113   : > { %v1822_v45 = vpop.f32.mrf.mxu1  ;;  %v515_v40 = vadd.f32 %v469_v44, %v398_v32 }
 0x114   : > { %v471_v46 = vpop.f32.mrf.mxu0 }
 0x115   : > { %v511_v47 = vpop.f32.mrf.mxu1 }
 0x116   : > { %v472_v48 = vpop.f32.mrf.mxu0 }
 0x117   : > { %v1823_v49 = vpop.f32.mrf.mxu1 }
 0x187   : > { %v596_v50 = vpop.f32.mrf.mxu0 }
 0x188   : > { %v643_v39 = vadd.f32 %v596_v50, %v514_v36 }
 0x189   : > { %v598_v51 = vpop.f32.mrf.mxu0  ;;  %v637_v52 = vpop.f32.mrf.mxu1 }
 0x18a   : > { %v644_v46 = vadd.f32 %v598_v51, %v515_v40  ;;  %v645_v47 = vadd.f32 %v637_v52, %v516_v41 }
 0x18b   : > { %v600_v53 = vpop.f32.mrf.mxu0  ;;  %v1828_v54 = vpop.f32.mrf.mxu1 }
 0x18d   : > { %v601_v55 = vpop.f32.mrf.mxu0  ;;  %v640_v56 = vpop.f32.mrf.mxu1 }
 0x18f   : > { %v1829_v57 = vpop.f32.mrf.mxu1  ;;  %v725_v58 = vpop.f32.mrf.mxu0 }
 0x190   : > { %v772_v48 = vadd.f32 %v725_v58, %v643_v39 }
 0x191   : > { %v727_v59 = vpop.f32.mrf.mxu0  ;;  %v766_v60 = vpop.f32.mrf.mxu1 }
 0x192   : > { %v773_v54 = vadd.f32 %v727_v59, %v644_v46  ;;  %v774_v55 = vadd.f32 %v766_v60, %v645_v47 }
 0x193   : > { %v729_v61 = vpop.f32.mrf.mxu0  ;;  %v1834_v62 = vpop.f32.mrf.mxu1 }
 0x195   : > { %v730_v63 = vpop.f32.mrf.mxu0  ;;  %v769_v2 = vpop.f32.mrf.mxu1 }
 0x197   : > { %v1835_v3 = vpop.f32.mrf.mxu1  ;;  %v854_v4 = vpop.f32.mrf.mxu0 }
 0x198   : > { %v901_v56 = vadd.f32 %v854_v4, %v772_v48 }
 0x199   : > { %v856_v5 = vpop.f32.mrf.mxu0  ;;  %v895_v6 = vpop.f32.mrf.mxu1 }
 0x19a   : > { %v902_v62 = vadd.f32 %v856_v5, %v773_v54  ;;  %v903_v42 = vadd.f32 %v895_v6, %v774_v55 }
 0x19b   : > { %v858_v7 = vpop.f32.mrf.mxu0  ;;  %v1840_v8 = vpop.f32.mrf.mxu1 }
 0x19d   : > { %v859_v9 = vpop.f32.mrf.mxu0  ;;  %v898_v10 = vpop.f32.mrf.mxu1 }
 0x19f   : > { %v1841_v11 = vpop.f32.mrf.mxu1  ;;  %v983_v12 = vpop.f32.mrf.mxu0 }
 0x1a0   : > { %v1030_v63 = vadd.f32 %v983_v12, %v901_v56  ;;  %v1550_v11 = vstv %s1549_s10  ;;  %s1969_s10 = scalar_lea.vmem %s2357_s18, 192 }
 0x1a1   : > { %v985_v13 = vpop.f32.mrf.mxu0  ;;  %v1024_v14 = vpop.f32.mrf.mxu1  ;;  %p1970_p13 = scmp.ne.s32.totalorder %s2357_s18, %s1969_s10  ;;  %p1977_p10 = scmp.lt.s32.totalorder %s1975_s22, %s1969_s10 }
 0x1a2   : > { %v1031_v43 = vadd.f32 %v985_v13, %v902_v62  ;;  %v1032_v2 = vadd.f32 %v1024_v14, %v903_v42 }
 0x1a3   : > { %v987_v15 = vpop.f32.mrf.mxu0  ;;  %v1846_v16 = vpop.f32.mrf.mxu1  ;;  %p1971_p1 = pnand %p1970_p13, %p2443_p0  ;;  %p1978_p2 = por %p1977_p10, %p1976_p8 }
 0x1a5   : > { %v988_v17 = vpop.f32.mrf.mxu0  ;;  %v1027_v18 = vpop.f32.mrf.mxu1  ;;  %p1972_p3 = pneg %p1971_p1 }
 0x1a7   : > { %v1847_v19 = vpop.f32.mrf.mxu1  ;;  %v1112_v20 = vpop.f32.mrf.mxu0  ;;  %p1979_p4 = pnand %p1978_p2, %p1972_p3 }
 0x1a8   : > { %v1159_v3 = vadd.f32 %v1112_v20, %v1030_v63 }
 0x1a9   : > { %v1114_v23 = vpop.f32.mrf.mxu0  ;;  %v1153_v24 = vpop.f32.mrf.mxu1 }
 0x1aa   : > { %v1160_v58 = vadd.f32 %v1114_v23, %v1031_v43  ;;  %v1161_v7 = vadd.f32 %v1153_v24, %v1032_v2 }
 0x1ab   : > { %v1116_v27 = vpop.f32.mrf.mxu0  ;;  %v1852_v28 = vpop.f32.mrf.mxu1 }
 0x1ad   : > { %v1117_v30 = vpop.f32.mrf.mxu0  ;;  %v1156_v31 = vpop.f32.mrf.mxu1 }
 0x1af   : > { %v1853_v34 = vpop.f32.mrf.mxu1  ;;  %v1241_v35 = vpop.f32.mrf.mxu0 }
 0x1b0   : > { %v1288_v8 = vadd.f32 %v1241_v35, %v1159_v3 }
 0x1b1   : > { %v1243_v37 = vpop.f32.mrf.mxu0  ;;  %v1282_v38 = vpop.f32.mrf.mxu1 }
 0x1b2   : > { %v1289_v4 = vadd.f32 %v1243_v37, %v1160_v58  ;;  %v1290_v9 = vadd.f32 %v1282_v38, %v1161_v7 }
 0x1b3   : > { %v1245_v1 = vpop.f32.mrf.mxu0  ;;  %v1858_v45 = vpop.f32.mrf.mxu1 }
 0x1b5   : > { %v1246_v49 = vpop.f32.mrf.mxu0  ;;  %v1285_v53 = vpop.f32.mrf.mxu1 }
 0x1b7   : > { %v1859_v57 = vpop.f32.mrf.mxu1  ;;  %v1370_v61 = vpop.f32.mrf.mxu0 }
 0x1b8   : > { %v1417_v10 = vadd.f32 %v1370_v61, %v1288_v8 }
 0x1b9   : > { %v1372_v50 = vpop.f32.mrf.mxu0  ;;  %v1411_v44 = vpop.f32.mrf.mxu1 }
 0x1ba   : > { %v1418_v12 = vadd.f32 %v1372_v50, %v1289_v4  ;;  %v1419_v15 = vadd.f32 %v1411_v44, %v1290_v9 }
 0x1bb   : > { %v1374_v51 = vpop.f32.mrf.mxu0  ;;  %v1864_v52 = vpop.f32.mrf.mxu1 }
 0x1bd   : > { %v1375_v59 = vpop.f32.mrf.mxu0  ;;  %v1414_v60 = vpop.f32.mrf.mxu1 }
 0x1bf   : > { %v1865_v5 = vpop.f32.mrf.mxu1  ;;  %v1499_v6 = vpop.f32.mrf.mxu0 }
 0x1c0   : > { %v1546_v13 = vadd.f32 %v1499_v6, %v1417_v10 }
 0x1c1   : > { %v1501_v14 = vpop.f32.mrf.mxu0  ;;  %v1540_v16 = vpop.f32.mrf.mxu1 }
 0x1c2   : > { %v1551_v17 = vsub.f32 %v1546_v13, %v1550_v11  ;;  %v1547_v18 = vadd.f32 %v1501_v14, %v1418_v12  ;;  %v1548_v19 = vadd.f32 %v1540_v16, %v1419_v15 }
 0x1c3   : > { %v1503_v20 = vpop.f32.mrf.mxu0  ;;  %v1870_v21 = vpop.f32.mrf.mxu1 }
 0x1c4   : > { %vm1554_vm11 = vcmp.ge.f32.partialorder %v1551_v17, 0.0  ;;  %v1552_v22 = vsub.f32 %v1547_v18, %v1550_v11  ;;  %v1553_v23 = vsub.f32 %v1548_v19, %v1550_v11 }
 0x1c5   : > { %v1786_v24 = vsel %vm1554_vm11, 1.0, %v2066_v0  ;;  %v1504_v25 = vpop.f32.mrf.mxu0  ;;  %v1543_v26 = vpop.f32.mrf.mxu1 }
 0x1c6   : > { %v1578_v27 = vsub.f32 %v1546_v13, %v1786_v24  ;;  %vm1555_vm12 = vcmp.ge.f32.partialorder %v1552_v22, 0.0  ;;  %vm1556_vm13 = vcmp.ge.f32.partialorder %v1553_v23, 0.0 }
 0x1c7   : > { %v1787_v28 = vsel %vm1555_vm12, 1.0, %v2066_v0  ;;  %v1788_v29 = vsel %vm1556_vm13, 1.0, %v2066_v0  ;;  %v1871_v30 = vpop.f32.mrf.mxu1 }
 0x1c8   : > { %1581 = vst [vmem:[%s357_s15] sm:$0xff] %v1578_v27  ;;  %v1796_v31 = vpack.c.bf16 %v1787_v28, %v1786_v24  ;;  %v1579_v32 = vsub.f32 %v1547_v18, %v1787_v28  ;;  %v1797_v33 = vpack.c.bf16 %v1788_v29, %v1788_v29  ;;  %v1580_v34 = vsub.f32 %v1548_v19, %v1788_v29 }
 0x1ca   : > { %1582 = vst [vmem:[%s357_s15 + $0x8] sm:$0xff] %v1579_v32  ;;  %1583 = vst [vmem:[%s357_s15 + $0x10] sm:$0xff] %v1580_v34 }
 0x1cb   : > { %1576 = vst [vmem:[%s350_s16] sm:$0xff] %v1796_v31  ;;  %1577 = vst [vmem:[%s350_s16 + $0x8] sm:$0xf] %v1797_v33 }
 0x1cc   : > { %1982 = shalt.err (!%p1979_p4)
}
 0x1cd   : > { %s1983_s16 = scalar_lea.hbm %s2355_s20, 192  ;;  %s1987_s9 = scalar_lea.hbm %s2432_s6, 384 }
 0x1ce   : > { %p1984_p9 = scmp.ne.s32.totalorder %s2355_s20, %s1983_s16  ;;  %p1988_p6 = scmp.lt.s32.totalorder %s2355_s20, %s2432_s6 }
 0x1cf   : > { %p1989_p11 = scmp.lt.s32.totalorder %s1987_s9, %s1983_s16 }
 0x1d0   : > { %p1985_p7 = pnand %p1984_p9, %p2443_p0 }
 0x1d1   : > { %p1990_p12 = por %p1989_p11, %p1988_p6 }
 0x1d2   : > { %p1986_p5 = pneg %p1985_p7 }
 0x1d4   : > { %p1991_p13 = pnand %p1990_p12, %p1986_p5 }
 0x1d6   : > { %1994 = shalt.err (!%p1991_p13)
}
 0x1d7   : > { %1877 = dma.vmem_to_hbm [thread:$0]  (%p2443_p0), %s2357_s18, 192, %s2355_s20, %s1585_s23  }
 0x1d8   : > { %s1590_s10 = scalar_lea.sflag [#allocation9], %s2209_s25  ;;  %s1995_s12 = scalar_lea.vmem %s2364_s19, 384 }
 0x1d9   : > { %p1996_p1 = scmp.ne.s32.totalorder %s2364_s19, %s1995_s12  ;;  %s2079_s24 = smov [#allocation8]  }
 0x1da   : > { %s1999_s22 = sshll.u32 %s2079_s24, 4  ;;  %s2000_s22 = int_to_ptr.vmem [resolvable:$false] %s1999_s22 }
 0x1db   : > { %p1997_p3 = pnand %p1996_p1, %p2443_p0  ;;  %s2001_s16 = scalar_lea.vmem %s2000_s22, 768 }
 0x1dc   : > { %p2002_p10 = scmp.lt.s32.totalorder %s2364_s19, %s2000_s22  ;;  %p2003_p2 = scmp.lt.s32.totalorder %s2001_s16, %s1995_s12 }
 0x1dd   : > { %p1998_p8 = pneg %p1997_p3 }
 0x1de   : > { %p2004_p4 = por %p2003_p2, %p2002_p10 }
 0x1e0   : > { %p2005_p9 = pnand %p2004_p4, %p1998_p8 }
 0x1e2   : > { %2008 = shalt.err (!%p2005_p9)
}
 0x1e3   : > { %s2009_s18 = scalar_lea.hbm %s2362_s21, 384  ;;  %s2013_s23 = scalar_lea.hbm %s2433_s7, 768 }
 0x1e4   : > { %p2010_p7 = scmp.ne.s32.totalorder %s2362_s21, %s2009_s18  ;;  %p2014_p11 = scmp.lt.s32.totalorder %s2362_s21, %s2433_s7 }
 0x1e5   : > { %p2015_p12 = scmp.lt.s32.totalorder %s2013_s23, %s2009_s18 }
 0x1e6   : > { %p2011_p5 = pnand %p2010_p7, %p2443_p0 }
 0x1e7   : > { %p2016_p13 = por %p2015_p12, %p2014_p11 }
 0x1e8   : > { %p2012_p6 = pneg %p2011_p5 }
 0x1ea   : > { %p2017_p1 = pnand %p2016_p13, %p2012_p6 }
 0x1ec   : > { %2020 = shalt.err (!%p2017_p1)
}
 0x1ed   : > { %1878 = dma.vmem_to_hbm [thread:$0]  (%p2443_p0), %s2364_s19, 384, %s2362_s21, %s1590_s10  }
 0x1ee PF: > { %s1630_s9 = sand.u32 1, %s2051_s26   ;;  %p2444_p3 = scmp.ne.s32.totalorder %s2438_s14, 0 }
 0x1ef   : > { %p2445_p8 = scmp.ge.s32.totalorder %s2063_s29, 2  ;;  %s1631_s4 = scalar_lea.sflag [#allocation6], %s1630_s9 }
 0x1f1   : > { %p1886_p10 = pnand %p2445_p8, %p2444_p3 }
 0x1f3   : > { %p1887_p2 = pneg %p1886_p10 }
 0x1f5   : > { %2042 = dma.done.wait (%p1887_p2), %s1631_s4, 192  }
 0x1f6   : > { %2044 = vsyncadd (%p1887_p2), %s1631_s4, 4294967104  ;;  %s1640_s30 = scalar_lea.sflag [#allocation9], %s1630_s9 }
 0x1f7   : > { %2046 = dma.done.wait (%p1887_p2), %s1640_s30, 384  }
 0x1f8   : > { %2048 = vsyncadd (%p1887_p2), %s1640_s30, 4294966912  ;;  %p25_p0 = scmp.ge.s32.totalorder %s2148_s8, 4   ;;  %s2446_s26 = smov %s2055_s27 }
 0x1f9   : > { %s2447_s27 = smov %s2059_s28  ;;  %s2448_s28 = smov %s2160_s11 }
 0x1fa   : > { %s2449_s29 = smov %s2148_s8  ;;  %27 = sbr.rel (!%p25_p0) target bundleno = 9 (0x9), region = 120 }
 0x1ff   :  { %1645 = vsyncpa [#allocation5], 1 }
 0x200   :  { %1647 = vsyncpa [#allocation5 + $0x1], 1 }
 0x201   :  { %1648 = vsyncpa [#allocation6], 1 }
 0x202   :  { %1650 = vsyncpa [#allocation6 + $0x1], 1 }
 0x203   :  { %1651 = vsyncpa [#allocation9], 1 }
 0x204   :  { %1653 = vsyncpa [#allocation9 + $0x1], 1 }

</bundles_post_ra>
